<compile_context>
chip_gen: v6e
topology: v6e:2x2x1
jax: 0.10.0
libtpu: 0.0.40
codegen_flags: <defaults>
</compile_context>

<pallas_src>
import jax
import jax.numpy as jnp
from jax.experimental import pallas as pl
from jax.experimental.pallas import tpu as pltpu


def _round_up(x, m):
    return (x + m - 1) // m * m


# ---------------------------------------------------------------------------
# FAST path: weights fully resident in VMEM, grid over batch tiles only.
# ---------------------------------------------------------------------------
def _projector_fused_kernel(x_ref, w1_ref, b1_ref, w2_ref, b2_ref, o_ref):
    h = jnp.dot(x_ref[...], w1_ref[...], preferred_element_type=jnp.float32)
    h = jnp.maximum(h + b1_ref[...], 0.0)
    out = jnp.dot(h.astype(w2_ref.dtype), w2_ref[...],
                  preferred_element_type=jnp.float32)
    o_ref[...] = (out + b2_ref[...]).astype(o_ref.dtype)


# ---------------------------------------------------------------------------
# CHUNKED path: hidden dimension streamed in tile_h-wide chunks, f32 accumulator.
# ---------------------------------------------------------------------------
def _projector_chunked_kernel(x_ref, w1_ref, b1_ref, w2_ref, b2_ref, o_ref,
                              acc_ref):
    k = pl.program_id(1)

    @pl.when(k == 0)
    def _():
        acc_ref[...] = jnp.zeros_like(acc_ref)

    # First linear (this hidden chunk) + bias + ReLU; f32 accumulation on MXU.
    h = jnp.dot(x_ref[...], w1_ref[...], preferred_element_type=jnp.float32)
    h = jnp.maximum(h + b1_ref[...], 0.0)

    # Second linear: accumulate this hidden chunk's contribution to the output.
    acc_ref[...] += jnp.dot(h.astype(w2_ref.dtype), w2_ref[...],
                            preferred_element_type=jnp.float32)

    @pl.when(k == pl.num_programs(1) - 1)
    def _():
        o_ref[...] = (acc_ref[...] + b2_ref[...]).astype(o_ref.dtype)


def projector_forward(x, w1, b1, w2, b2, *, tile_b=256, tile_h=256,
                      compute_dtype=jnp.bfloat16,
                      fast_path_vmem_budget=20 * 1024 * 1024):
    """x: (B, D_in); w1: (D_in, H); b1: (H,); w2: (H, D_out); b2: (D_out,)."""
    B, D_in = x.shape
    H = w1.shape[1]
    D_out = w2.shape[1]
    out_dtype = x.dtype
    out_itemsize = jnp.dtype(out_dtype).itemsize
    c_itemsize = jnp.dtype(compute_dtype).itemsize

    # --- batch tiling: clamp tile to (8-aligned) batch, pad ragged batches ---
    tile_b = min(tile_b, _round_up(B, 8))
    B_pad = _round_up(B, tile_b)
    if B_pad != B:
        x = jnp.pad(x, ((0, B_pad - B), (0, 0)))

    # bf16 activations / weights, f32 biases (added after f32 accumulation).
    x_c = x.astype(compute_dtype)
    w1_c = w1.astype(compute_dtype)
    w2_c = w2.astype(compute_dtype)
    b1_2d = b1.reshape(1, H).astype(jnp.float32)
    b2_2d = b2.reshape(1, D_out).astype(jnp.float32)

    flops = 2 * B_pad * (D_in * H + H * D_out)
    bytes_accessed = (x_c.size * c_itemsize
                      + w1_c.size * c_itemsize
                      + w2_c.size * c_itemsize
                      + b1_2d.size * 4 + b2_2d.size * 4
                      + B_pad * D_out * out_itemsize)
    cost = pl.CostEstimate(flops=flops, transcendentals=0,
                           bytes_accessed=bytes_accessed)
    compiler_params = pltpu.CompilerParams(
        dimension_semantics=("parallel",),
        vmem_limit_bytes=32 * 1024 * 1024)

    # Estimated VMEM footprint of the fully-resident (fast) path.
    fast_bytes = (2 * tile_b * D_in * c_itemsize      # x tile (double-buffered)
                  + D_in * H * c_itemsize             # W1 (resident)
                  + H * D_out * c_itemsize            # W2 (resident)
                  + H * 4 + D_out * 4                 # biases (f32, resident)
                  + tile_b * H * 4                    # hidden intermediate (f32)
                  + 2 * tile_b * D_out * out_itemsize)  # out tile (double-buffered)

    if fast_bytes <= fast_path_vmem_budget:
        # ---------------- fast path: weights resident, fused MLP ----------------
        out = pl.pallas_call(
            _projector_fused_kernel,
            out_shape=jax.ShapeDtypeStruct((B_pad, D_out), out_dtype),
            grid_spec=pltpu.PrefetchScalarGridSpec(
                num_scalar_prefetch=0,
                grid=(B_pad // tile_b,),
                in_specs=[
                    pl.BlockSpec((tile_b, D_in), lambda i: (i, 0)),  # x tile
                    pl.BlockSpec((D_in, H), lambda i: (0, 0)),       # W1 (resident)
                    pl.BlockSpec((1, H), lambda i: (0, 0)),          # b1 (resident)
                    pl.BlockSpec((H, D_out), lambda i: (0, 0)),      # W2 (resident)
                    pl.BlockSpec((1, D_out), lambda i: (0, 0)),      # b2 (resident)
                ],
                out_specs=pl.BlockSpec((tile_b, D_out), lambda i: (i, 0)),
            ),
            compiler_params=compiler_params,
            cost_estimate=cost,
        )(x_c, w1_c, b1_2d, w2_c, b2_2d)
    else:
        # -------------- chunked path: stream hidden dim, f32 accumulator --------------
        if H % tile_h != 0:
            tile_h = H  # TODO(synk): pad H for odd hidden sizes; defaults divide evenly.
        n_h = H // tile_h

        compiler_params = pltpu.CompilerParams(
            dimension_semantics=("parallel", "arbitrary"),
            vmem_limit_bytes=32 * 1024 * 1024)

        out = pl.pallas_call(
            _projector_chunked_kernel,
            out_shape=jax.ShapeDtypeStruct((B_pad, D_out), out_dtype),
            grid_spec=pltpu.PrefetchScalarGridSpec(
                num_scalar_prefetch=0,
                grid=(B_pad // tile_b, n_h),
                in_specs=[
                    pl.BlockSpec((tile_b, D_in), lambda i, k: (i, 0)),   # x (resident over k)
                    pl.BlockSpec((D_in, tile_h), lambda i, k: (0, k)),   # W1 hidden chunk
                    pl.BlockSpec((1, tile_h), lambda i, k: (0, k)),      # b1 hidden chunk
                    pl.BlockSpec((tile_h, D_out), lambda i, k: (k, 0)),  # W2 hidden chunk
                    pl.BlockSpec((1, D_out), lambda i, k: (0, 0)),       # b2 (resident)
                ],
                out_specs=pl.BlockSpec((tile_b, D_out), lambda i, k: (i, 0)),
                scratch_shapes=[pltpu.VMEM((tile_b, D_out), jnp.float32)],
            ),
            compiler_params=compiler_params,
            cost_estimate=cost,
        )(x_c, w1_c, b1_2d, w2_c, b2_2d)

    if B_pad != B:
        out = out[:B]
    return out


def init_projector_params(key, input_dim, output_dim=128,
                          projection_hidden_size=1024, dtype=jnp.float32):
    """nn.Linear-style init: U(-1/sqrt(fan_in), 1/sqrt(fan_in)).

    Weights are returned already transposed to (in, out) for the kernel."""
    k1, k2, k3, k4 = jax.random.split(key, 4)
    bound1 = 1.0 / jnp.sqrt(jnp.float32(input_dim))
    bound2 = 1.0 / jnp.sqrt(jnp.float32(projection_hidden_size))
    w1 = jax.random.uniform(k1, (input_dim, projection_hidden_size),
                            dtype, -bound1, bound1)
    b1 = jax.random.uniform(k2, (projection_hidden_size,), dtype, -bound1, bound1)
    w2 = jax.random.uniform(k3, (projection_hidden_size, output_dim),
                            dtype, -bound2, bound2)
    b2 = jax.random.uniform(k4, (output_dim,), dtype, -bound2, bound2)
    return w1, b1, w2, b2


if __name__ == "__main__":
    key = jax.random.PRNGKey(0)
    kx, kp = jax.random.split(key)

    B = 8
    input_dim = 256
    hidden = 512          # 2 hidden chunks of 256 -> exercises the chunked path too
    output_dim = 128

    x = jax.random.normal(kx, (B, input_dim), jnp.float32)
    w1, b1, w2, b2 = init_projector_params(
        kp, input_dim, output_dim=output_dim, projection_hidden_size=hidden)

    # Pure-JAX f32 reference; tolerance loosened for bf16 inputs / f32 accumulation.
    ref = jnp.maximum(x @ w1 + b1, 0.0) @ w2 + b2

    # Fast (fully-resident) path.
    out_fast = jax.block_until_ready(projector_forward(x, w1, b1, w2, b2))
    assert out_fast.shape == (B, output_dim)
    assert jnp.allclose(out_fast, ref, atol=2e-2, rtol=2e-2), "fast path mismatch"

    # Chunked-hidden path (force it by setting the fast-path budget to 0).
    out_chunked = jax.block_until_ready(
        projector_forward(x, w1, b1, w2, b2, fast_path_vmem_budget=0))
    assert out_chunked.shape == (B, output_dim)
    assert jnp.allclose(out_chunked, ref, atol=2e-2, rtol=2e-2), "chunked path mismatch"

    print("KERNEL_OK")
</pallas_src>

<mosaic_0001>
module attributes {stable_mosaic.version = 11 : i64} {
  func.func @_projector_fused_kernel(%arg0: i32, %arg1: memref<8x256xbf16, #tpu.memory_space<vmem>>, %arg2: memref<256x512xbf16, #tpu.memory_space<vmem>>, %arg3: memref<1x512xf32, #tpu.memory_space<vmem>>, %arg4: memref<512x128xbf16, #tpu.memory_space<vmem>>, %arg5: memref<1x128xf32, #tpu.memory_space<vmem>>, %arg6: memref<8x128xf32, #tpu.memory_space<vmem>>) attributes {dimension_semantics = [#tpu.dimension_semantics<parallel>], iteration_bounds = array<i64: 1>, scalar_prefetch = 0 : i64, scratch_operands = 0 : i64, tpu.core_type = #tpu.core_type<tc>, window_params = [{transform_indices = @transform_0, window_bounds = array<i64: 8, 256>}, {pipeline_mode = #tpu.pipeline_mode<synchronous>, transform_indices = @transform_1, window_bounds = array<i64: 256, 512>}, {pipeline_mode = #tpu.pipeline_mode<synchronous>, transform_indices = @transform_2, window_bounds = array<i64: 1, 512>}, {pipeline_mode = #tpu.pipeline_mode<synchronous>, transform_indices = @transform_3, window_bounds = array<i64: 512, 128>}, {pipeline_mode = #tpu.pipeline_mode<synchronous>, transform_indices = @transform_4, window_bounds = array<i64: 1, 128>}, {transform_indices = @transform_5, window_bounds = array<i64: 8, 128>}]} {
    %c0 = arith.constant 0 : index
    %c0_0 = arith.constant 0 : index
    %0 = vector.load %arg1[%c0, %c0_0] : memref<8x256xbf16, #tpu.memory_space<vmem>>, vector<8x256xbf16>
    %c0_1 = arith.constant 0 : index
    %c0_2 = arith.constant 0 : index
    %1 = vector.load %arg2[%c0_1, %c0_2] : memref<256x512xbf16, #tpu.memory_space<vmem>>, vector<256x512xbf16>
    %cst = arith.constant dense<0.000000e+00> : vector<8x512xf32>
    %2 = tpu.matmul %0, %1, %cst {dimension_numbers = #tpu.dot_dimension_numbers<[1], [0], [0], [1], [0, 0, 1, 1], [], []>} : vector<8x256xbf16>, vector<256x512xbf16>, vector<8x512xf32> -> vector<8x512xf32>
    %c0_3 = arith.constant 0 : index
    %c0_4 = arith.constant 0 : index
    %3 = vector.load %arg3[%c0_3, %c0_4] : memref<1x512xf32, #tpu.memory_space<vmem>>, vector<1x512xf32>
    %4 = vector.broadcast %3 : vector<1x512xf32> to vector<8x512xf32>
    %5 = arith.addf %2, %4 : vector<8x512xf32>
    %cst_5 = arith.constant 0.000000e+00 : f32
    %6 = vector.broadcast %cst_5 : f32 to vector<8x512xf32>
    %7 = arith.maximumf %5, %6 : vector<8x512xf32>
    %8 = arith.truncf %7 : vector<8x512xf32> to vector<8x512xbf16>
    %c0_6 = arith.constant 0 : index
    %c0_7 = arith.constant 0 : index
    %9 = vector.load %arg4[%c0_6, %c0_7] : memref<512x128xbf16, #tpu.memory_space<vmem>>, vector<512x128xbf16>
    %cst_8 = arith.constant dense<0.000000e+00> : vector<8x128xf32>
    %10 = tpu.matmul %8, %9, %cst_8 {dimension_numbers = #tpu.dot_dimension_numbers<[1], [0], [0], [1], [0, 0, 1, 1], [], []>} : vector<8x512xbf16>, vector<512x128xbf16>, vector<8x128xf32> -> vector<8x128xf32>
    %c0_9 = arith.constant 0 : index
    %c0_10 = arith.constant 0 : index
    %11 = vector.load %arg5[%c0_9, %c0_10] : memref<1x128xf32, #tpu.memory_space<vmem>>, vector<1x128xf32>
    %12 = vector.broadcast %11 : vector<1x128xf32> to vector<8x128xf32>
    %13 = arith.addf %10, %12 : vector<8x128xf32>
    %c0_11 = arith.constant 0 : index
    %c0_12 = arith.constant 0 : index
    %14 = vector.load %arg6[%c0_11, %c0_12] : memref<8x128xf32, #tpu.memory_space<vmem>>, vector<8x128xf32>
    tpu.vector_store %arg6[%c0_11, %c0_12], %13 {strides = array<i32>} : memref<8x128xf32, #tpu.memory_space<vmem>>, vector<8x128xf32>,
    return
  }
  func.func @transform_0(%arg0: i32) -> (i32, i32) {
    %c0_i32 = arith.constant 0 : i32
    %c0_i32_0 = arith.constant 0 : i32
    return %arg0, %c0_i32 : i32, i32
  }
  func.func @transform_1(%arg0: i32) -> (i32, i32) {
    %c0_i32 = arith.constant 0 : i32
    %c0_i32_0 = arith.constant 0 : i32
    %c0_i32_1 = arith.constant 0 : i32
    return %c0_i32, %c0_i32_0 : i32, i32
  }
  func.func @transform_2(%arg0: i32) -> (i32, i32) {
    %c0_i32 = arith.constant 0 : i32
    %c0_i32_0 = arith.constant 0 : i32
    %c0_i32_1 = arith.constant 0 : i32
    return %c0_i32, %c0_i32_0 : i32, i32
  }
  func.func @transform_3(%arg0: i32) -> (i32, i32) {
    %c0_i32 = arith.constant 0 : i32
    %c0_i32_0 = arith.constant 0 : i32
    %c0_i32_1 = arith.constant 0 : i32
    return %c0_i32, %c0_i32_0 : i32, i32
  }
  func.func @transform_4(%arg0: i32) -> (i32, i32) {
    %c0_i32 = arith.constant 0 : i32
    %c0_i32_0 = arith.constant 0 : i32
    %c0_i32_1 = arith.constant 0 : i32
    return %c0_i32, %c0_i32_0 : i32, i32
  }
  func.func @transform_5(%arg0: i32) -> (i32, i32) {
    %c0_i32 = arith.constant 0 : i32
    %c0_i32_0 = arith.constant 0 : i32
    return %arg0, %c0_i32 : i32, i32
  }
}

</mosaic_0001>

<bundles_post_ra>
// kernel: tpu_custom_call.1
= control target key start
LH: loop header
LB: loop body
LE: loop exit
PB: predicated region body
PF: predicated region fallthrough
CT: control target
= control target key end

     0   :  { %10 = vsyncpa [#allocation3], 0  ;;  %s1385_s0 = inlined_call_operand.hbm [shape: bf16[8,256], index: 0, kind: input, shape index: {}]   ;;  %s1386_s1 = inlined_call_operand.hbm [shape: bf16[256,512], index: 1, kind: input, shape index: {}]   ;;  %s1387_s2 = inlined_call_operand.hbm [shape: f32[1,512], index: 2, kind: input, shape index: {}]   ;;  %s1388_s3 = inlined_call_operand.hbm [shape: bf16[512,128], index: 3, kind: input, shape index: {}]   ;;  %s1389_s4 = inlined_call_operand.vmem [shape: f32[1,128], index: 4, kind: input, shape index: {}]   ;;  %s1390_s5 = inlined_call_operand.hbm [shape: f32[8,128], index: 5, kind: output, shape index: {}]  }
   0x1   :  { %11 = vsyncpa [#allocation6], 0 }
   0x2   :  { %12 = vsyncpa [#allocation9], 0 }
   0x3   :  { %13 = vsyncpa [#allocation4], 0  ;;  %s1328_s18 = smov [#allocation5]  }
   0x4   :  { %s29_s19 = sshll.u32 %s1328_s18, 4  ;;  %s30_s19 = int_to_ptr.vmem [resolvable:$true] %s29_s19 }
   0x5   :  { %s1228_s20 = scalar_lea.vmem %s30_s19, 8192  ;;  %p1233_p1 = scmp.lt.s32.totalorder %s30_s19, %s30_s19 }
   0x6   :  { %p1229_p0 = scmp.ne.s32.totalorder %s30_s19, %s1228_s20  ;;  %p1234_p2 = scmp.lt.s32.totalorder %s1228_s20, %s1228_s20 }
   0x8   :  { %p1235_p3 = por %p1234_p2, %p1233_p1 }
   0xa   :  { %p1236_p4 = pnand %p1235_p3, %p1229_p0 }
   0xc   :  { %1239 = shalt.err (!%p1236_p4)
}
   0xd   :  { %s1329_s21 = smov 256   ;;  %s1330_s22 = smov 16  }
   0xe   :  { %35 = dma.hbm_to_vmem [thread:$0]  %s1386_s1, 8192, %s30_s19, [#allocation6], %s1329_s21, %s1329_s21, %s1330_s22  }
   0xf   :  { %s1331_s25 = smov [#allocation2]   ;;  %s1332_s27 = smov [#allocation7]  }
  0x10   :  { %s20_s26 = sshll.u32 %s1331_s25, 4  ;;  %s42_s28 = sshll.u32 %s1332_s27, 4  ;;  %s21_s26 = int_to_ptr.vmem [resolvable:$true] %s20_s26  ;;  %s43_s28 = int_to_ptr.vmem [resolvable:$true] %s42_s28 }
  0x11   :  { %s1248_s29 = scalar_lea.vmem %s21_s26, 128  ;;  %p1253_p6 = scmp.lt.s32.totalorder %s21_s26, %s21_s26 }
  0x12   :  { %p1249_p5 = scmp.ne.s32.totalorder %s21_s26, %s1248_s29  ;;  %p1254_p7 = scmp.lt.s32.totalorder %s1248_s29, %s1248_s29 }
  0x14   :  { %p1255_p8 = por %p1254_p7, %p1253_p6 }
  0x16   :  { %p1256_p9 = pnand %p1255_p8, %p1249_p5 }
  0x18   :  { %1259 = shalt.err (!%p1256_p9)
}
  0x19   :  { %23 = dma.hbm_to_vmem [thread:$0]  %s1385_s0, 128, %s21_s26, [#allocation3]  }
  0x1a   :  { %s1268_s7 = scalar_lea.vmem %s43_s28, 64  ;;  %p1273_p11 = scmp.lt.s32.totalorder %s43_s28, %s43_s28 }
  0x1b   :  { %p1269_p10 = scmp.ne.s32.totalorder %s43_s28, %s1268_s7  ;;  %p1274_p12 = scmp.lt.s32.totalorder %s1268_s7, %s1268_s7 }
  0x1d   :  { %p1275_p13 = por %p1274_p12, %p1273_p11 }
  0x1f   :  { %p1276_p0 = pnand %p1275_p13, %p1269_p10 }
  0x21   :  { %1279 = shalt.err (!%p1276_p0)
}
  0x22   :  { %45 = dma.hbm_to_vmem [thread:$0]  %s1387_s2, 64, %s43_s28, [#allocation6]  }
  0x23   :  { %s1333_s9 = smov [#allocation8]  }
  0x24   :  { %s51_s10 = sshll.u32 %s1333_s9, 4  ;;  %s52_s10 = int_to_ptr.vmem [resolvable:$true] %s51_s10 }
  0x25   :  { %s1288_s11 = scalar_lea.vmem %s52_s10, 4096  ;;  %p1293_p2 = scmp.lt.s32.totalorder %s52_s10, %s52_s10 }
  0x26   :  { %p1289_p1 = scmp.ne.s32.totalorder %s52_s10, %s1288_s11  ;;  %p1294_p3 = scmp.lt.s32.totalorder %s1288_s11, %s1288_s11 }
  0x28   :  { %p1295_p4 = por %p1294_p3, %p1293_p2 }
  0x2a   :  { %p1296_p5 = pnand %p1295_p4, %p1289_p1 }
  0x2c   :  { %1299 = shalt.err (!%p1296_p5)
}
  0x2d   :  { %s1334_s0 = smov 64   ;;  %s1335_s12 = smov 4  }
  0x2e   :  { %57 = dma.hbm_to_vmem [thread:$0]  %s1388_s3, 4096, %s52_s10, [#allocation9], %s1334_s0, %s1334_s0, %s1335_s12  }
  0x2f   :  { %1320 = dma.done.wait [#allocation3], 128  }
  0x30   :  { %1321 = vsyncadd [#allocation3], 4294967168 }
  0x31   :  { %1322 = dma.done.wait [#allocation6], 8256  }
  0x32   :  { %1323 = vsyncadd [#allocation6], 4294959040 }
  0x33   :  { %1324 = dma.done.wait [#allocation9], 4096  }
  0x34   :  { %1325 = vsyncadd [#allocation9], 4294963200  ;;  %v1090_v0 = vld [vmem:[#allocation5 + $0xe4] ss:$16 sps:$4 sm:$0xff]   ;;  %v1092_v1 = vld [vmem:[#allocation5 + $0xec] ss:$16 sps:$4 sm:$0xff]  }
  0x35   :  { %487 = vmatprep.subr.bf16.mxu0 %v1090_v0  ;;  %v1094_v2 = vld [vmem:[#allocation5 + $0xe0] ss:$16 sps:$4 sm:$0xff]   ;;  %v1095_v3 = vld [vmem:[#allocation5 + $0xe8] ss:$16 sps:$4 sm:$0xff]   ;;  %528 = vmatprep.subr.bf16.mxu1 %v1092_v1  ;;  %v1096_v4 = vld [vmem:[#allocation5 + $0xc4] ss:$16 sps:$4 sm:$0xff]  }
  0x36   :  { %488 = vmatpush1.bf16.msra.mxu0 %v1094_v2  ;;  %529 = vmatpush1.bf16.msra.mxu1 %v1095_v3  ;;  %v1098_v5 = vld [vmem:[#allocation5 + $0xcc] ss:$16 sps:$4 sm:$0xff]   ;;  %v1100_v6 = vld [vmem:[#allocation5 + $0xc0] ss:$16 sps:$4 sm:$0xff]   ;;  %v1101_v7 = vld [vmem:[#allocation5 + $0xc8] ss:$16 sps:$4 sm:$0xff]  }
  0x37   :  { %489 = vmatprep.subr.bf16.mxu0 %v1096_v4  ;;  %530 = vmatprep.subr.bf16.mxu1 %v1098_v5  ;;  %v1102_v8 = vld [vmem:[#allocation5 + $0xa4] ss:$16 sps:$4 sm:$0xff]   ;;  %v1104_v9 = vld [vmem:[#allocation5 + $0xac] ss:$16 sps:$4 sm:$0xff]   ;;  %v1106_v10 = vld [vmem:[#allocation5 + $0xa0] ss:$16 sps:$4 sm:$0xff]  }
  0x38   :  { %v1107_v11 = vld [vmem:[#allocation5 + $0xa8] ss:$16 sps:$4 sm:$0xff]   ;;  %v1108_v12 = vld [vmem:[#allocation5 + $0x84] ss:$16 sps:$4 sm:$0xff]   ;;  %v1110_v13 = vld [vmem:[#allocation5 + $0x8c] ss:$16 sps:$4 sm:$0xff]  }
  0x39   :  { %v1112_v14 = vld [vmem:[#allocation5 + $0x80] ss:$16 sps:$4 sm:$0xff]   ;;  %v1113_v15 = vld [vmem:[#allocation5 + $0x88] ss:$16 sps:$4 sm:$0xff]   ;;  %v1114_v16 = vld [vmem:[#allocation5 + $0x64] ss:$16 sps:$4 sm:$0xff]  }
  0x3a   :  { %490 = vmatpush1.bf16.msra.mxu0 %v1100_v6  ;;  %531 = vmatpush1.bf16.msra.mxu1 %v1101_v7  ;;  %v1116_v17 = vld [vmem:[#allocation5 + $0x6c] ss:$16 sps:$4 sm:$0xff]   ;;  %v1118_v18 = vld [vmem:[#allocation5 + $0x60] ss:$16 sps:$4 sm:$0xff]   ;;  %v1119_v19 = vld [vmem:[#allocation5 + $0x68] ss:$16 sps:$4 sm:$0xff]  }
  0x3b   :  { %491 = vmatprep.subr.bf16.mxu0 %v1102_v8  ;;  %532 = vmatprep.subr.bf16.mxu1 %v1104_v9  ;;  %v1120_v20 = vld [vmem:[#allocation5 + $0x44] ss:$16 sps:$4 sm:$0xff]   ;;  %v1122_v21 = vld [vmem:[#allocation5 + $0x4c] ss:$16 sps:$4 sm:$0xff]   ;;  %v1124_v22 = vld [vmem:[#allocation5 + $0x40] ss:$16 sps:$4 sm:$0xff]  }
  0x3c   :  { %v1125_v23 = vld [vmem:[#allocation5 + $0x48] ss:$16 sps:$4 sm:$0xff]   ;;  %v1126_v24 = vld [vmem:[#allocation5 + $0x24] ss:$16 sps:$4 sm:$0xff]   ;;  %v1128_v25 = vld [vmem:[#allocation5 + $0x2c] ss:$16 sps:$4 sm:$0xff]  }
  0x3d   :  { %v1130_v26 = vld [vmem:[#allocation5 + $0x20] ss:$16 sps:$4 sm:$0xff]   ;;  %v1131_v27 = vld [vmem:[#allocation5 + $0x28] ss:$16 sps:$4 sm:$0xff]   ;;  %v1132_v28 = vld [vmem:[#allocation5 + $0x4] ss:$16 sps:$4 sm:$0xff]  }
  0x3e   :  { %492 = vmatpush1.bf16.msra.mxu0 %v1106_v10  ;;  %533 = vmatpush1.bf16.msra.mxu1 %v1107_v11  ;;  %v1134_v29 = vld [vmem:[#allocation5 + $0xc] ss:$16 sps:$4 sm:$0xff]   ;;  %v1136_v30 = vld [vmem:[#allocation5] ss:$16 sps:$4 sm:$0xff]   ;;  %v1137_v31 = vld [vmem:[#allocation5 + $0x8] ss:$16 sps:$4 sm:$0xff]  }
  0x3f   :  { %493 = vmatprep.subr.bf16.mxu0 %v1108_v12  ;;  %534 = vmatprep.subr.bf16.mxu1 %v1110_v13  ;;  %v1138_v32 = vld [vmem:[#allocation5 + $0x1e4] ss:$16 sps:$4 sm:$0xff]   ;;  %v1140_v33 = vld [vmem:[#allocation5 + $0x1ec] ss:$16 sps:$4 sm:$0xff]   ;;  %v1142_v34 = vld [vmem:[#allocation5 + $0x1e0] ss:$16 sps:$4 sm:$0xff]  }
  0x40   :  { %v1143_v35 = vld [vmem:[#allocation5 + $0x1e8] ss:$16 sps:$4 sm:$0xff]   ;;  %v1144_v36 = vld [vmem:[#allocation5 + $0x1c4] ss:$16 sps:$4 sm:$0xff]   ;;  %v1146_v37 = vld [vmem:[#allocation5 + $0x1cc] ss:$16 sps:$4 sm:$0xff]  }
  0x41   :  { %v1148_v38 = vld [vmem:[#allocation5 + $0x1c0] ss:$16 sps:$4 sm:$0xff]   ;;  %v1149_v39 = vld [vmem:[#allocation5 + $0x1c8] ss:$16 sps:$4 sm:$0xff]   ;;  %v1150_v40 = vld [vmem:[#allocation5 + $0x1a4] ss:$16 sps:$4 sm:$0xff]  }
  0x42   :  { %494 = vmatpush1.bf16.msra.mxu0 %v1112_v14  ;;  %535 = vmatpush1.bf16.msra.mxu1 %v1113_v15  ;;  %v1152_v41 = vld [vmem:[#allocation5 + $0x1ac] ss:$16 sps:$4 sm:$0xff]   ;;  %v1154_v42 = vld [vmem:[#allocation5 + $0x1a0] ss:$16 sps:$4 sm:$0xff]   ;;  %v1155_v43 = vld [vmem:[#allocation5 + $0x1a8] ss:$16 sps:$4 sm:$0xff]  }
  0x43   :  { %495 = vmatprep.subr.bf16.mxu0 %v1114_v16  ;;  %536 = vmatprep.subr.bf16.mxu1 %v1116_v17  ;;  %v1156_v44 = vld [vmem:[#allocation5 + $0x184] ss:$16 sps:$4 sm:$0xff]   ;;  %v1158_v45 = vld [vmem:[#allocation5 + $0x18c] ss:$16 sps:$4 sm:$0xff]   ;;  %v1160_v46 = vld [vmem:[#allocation5 + $0x180] ss:$16 sps:$4 sm:$0xff]  }
  0x44   :  { %v73_v47 = vld [vmem:[#allocation2] sm:$0xff]  ;;  %v1162_v50 = vld [vmem:[#allocation5 + $0x164] ss:$16 sps:$4 sm:$0xff]   ;;  %v1166_v52 = vld [vmem:[#allocation5 + $0x160] ss:$16 sps:$4 sm:$0xff]   ;;  %s1336_s15 = smov [#allocation10]  }
  0x45   :  { %v1161_v48 = vld [vmem:[#allocation5 + $0x188] ss:$16 sps:$4 sm:$0xff]   ;;  %v939_v49 = vcombine.high %v73_v47, %v73_v47  ;;  %v1164_v51 = vld [vmem:[#allocation5 + $0x16c] ss:$16 sps:$4 sm:$0xff]   ;;  %v1168_v54 = vld [vmem:[#allocation5 + $0x144] ss:$16 sps:$4 sm:$0xff]   ;;  %v938_v5 = vcombine.low %v73_v47, %v73_v47 }
  0x46   :  { %496 = vmatpush1.bf16.msra.mxu0 %v1118_v18  ;;  %537 = vmatpush1.bf16.msra.mxu1 %v1119_v19  ;;  %v1167_v53 = vld [vmem:[#allocation5 + $0x168] ss:$16 sps:$4 sm:$0xff]   ;;  %v1170_v55 = vld [vmem:[#allocation5 + $0x14c] ss:$16 sps:$4 sm:$0xff]   ;;  %v1172_v56 = vld [vmem:[#allocation5 + $0x140] ss:$16 sps:$4 sm:$0xff]  }
  0x47   :  { %497 = vmatprep.subr.bf16.mxu0 %v1120_v20  ;;  %538 = vmatprep.subr.bf16.mxu1 %v1122_v21  ;;  %v1173_v57 = vld [vmem:[#allocation5 + $0x148] ss:$16 sps:$4 sm:$0xff]   ;;  %v1174_v58 = vld [vmem:[#allocation5 + $0x124] ss:$16 sps:$4 sm:$0xff]   ;;  %v1176_v59 = vld [vmem:[#allocation5 + $0x12c] ss:$16 sps:$4 sm:$0xff]  }
  0x48   :  { %519 = vmatprep.mubr.bf16.mxu0 %v939_v49  ;;  %560 = vmatprep.mubr.bf16.mxu1 %v939_v49  ;;  %v1178_v60 = vld [vmem:[#allocation5 + $0x120] ss:$16 sps:$4 sm:$0xff]   ;;  %v1179_v61 = vld [vmem:[#allocation5 + $0x128] ss:$16 sps:$4 sm:$0xff]   ;;  %v1180_v62 = vld [vmem:[#allocation5 + $0x104] ss:$16 sps:$4 sm:$0xff]  }
  0x49   :  { %v1182_v63 = vld [vmem:[#allocation5 + $0x10c] ss:$16 sps:$4 sm:$0xff]   ;;  %v1184_v0 = vld [vmem:[#allocation5 + $0x100] ss:$16 sps:$4 sm:$0xff]   ;;  %v1185_v1 = vld [vmem:[#allocation5 + $0x108] ss:$16 sps:$4 sm:$0xff]  }
  0x4a   :  { %498 = vmatpush1.bf16.msra.mxu0 %v1124_v22  ;;  %539 = vmatpush1.bf16.msra.mxu1 %v1125_v23  ;;  %v1188_v2 = vld [vmem:[#allocation8 + $0x78] sm:$0xff]   ;;  %v1192_v7 = vld [vmem:[#allocation8 + $0x70] sm:$0xff]   ;;  %v1196_v11 = vld [vmem:[#allocation8 + $0x68] sm:$0xff]   ;;  %s927_s16 = sshll.u32 %s1336_s15, 4  ;;  %s928_s16 = int_to_ptr.vmem [resolvable:$true] %s927_s16 }
  0x4b   :  { %499 = vmatprep.subr.bf16.mxu0 %v1126_v24  ;;  %540 = vmatprep.subr.bf16.mxu1 %v1128_v25  ;;  %v1189_v3 = vld [vmem:[#allocation8 + $0xf8] sm:$0xff]   ;;  %v1193_v8 = vld [vmem:[#allocation8 + $0xf0] sm:$0xff]   ;;  %v1197_v12 = vld [vmem:[#allocation8 + $0xe8] sm:$0xff]   ;;  %s1300_s17 = scalar_lea.vmem %s928_s16, 128  ;;  %p1305_p7 = scmp.lt.s32.totalorder %s928_s16, %s928_s16 }
  0x4c   :  { %v1190_v4 = vld [vmem:[#allocation8 + $0x38] sm:$0xff]   ;;  %v1194_v9 = vld [vmem:[#allocation8 + $0x30] sm:$0xff]   ;;  %v1198_v13 = vld [vmem:[#allocation8 + $0x28] sm:$0xff]   ;;  %p1301_p6 = scmp.ne.s32.totalorder %s928_s16, %s1300_s17  ;;  %p1306_p8 = scmp.lt.s32.totalorder %s1300_s17, %s1300_s17 }
  0x4d   :  { %v1191_v6 = vld [vmem:[#allocation8 + $0xb8] sm:$0xff]   ;;  %v1195_v10 = vld [vmem:[#allocation8 + $0xb0] sm:$0xff]   ;;  %v1199_v14 = vld [vmem:[#allocation8 + $0xa8] sm:$0xff]  }
  0x4e   :  { %500 = vmatpush1.bf16.msra.mxu0 %v1130_v26  ;;  %541 = vmatpush1.bf16.msra.mxu1 %v1131_v27  ;;  %v1200_v15 = vld [vmem:[#allocation8 + $0x60] sm:$0xff]   ;;  %v1204_v19 = vld [vmem:[#allocation8 + $0x58] sm:$0xff]   ;;  %v1208_v23 = vld [vmem:[#allocation8 + $0x50] sm:$0xff]   ;;  %p1307_p9 = por %p1306_p8, %p1305_p7 }
  0x4f   :  { %501 = vmatprep.subr.bf16.mxu0 %v1132_v28  ;;  %542 = vmatprep.subr.bf16.mxu1 %v1134_v29  ;;  %v1201_v16 = vld [vmem:[#allocation8 + $0xe0] sm:$0xff]   ;;  %v1205_v20 = vld [vmem:[#allocation8 + $0xd8] sm:$0xff]   ;;  %v1209_v24 = vld [vmem:[#allocation8 + $0xd0] sm:$0xff]  }
  0x50   :  { %v1202_v17 = vld [vmem:[#allocation8 + $0x20] sm:$0xff]   ;;  %v1206_v21 = vld [vmem:[#allocation8 + $0x18] sm:$0xff]   ;;  %v1210_v25 = vld [vmem:[#allocation8 + $0x10] sm:$0xff]   ;;  %p1308_p10 = pnand %p1307_p9, %p1301_p6 }
  0x51   :  { %v1203_v18 = vld [vmem:[#allocation8 + $0xa0] sm:$0xff]   ;;  %v1207_v22 = vld [vmem:[#allocation8 + $0x98] sm:$0xff]   ;;  %v1211_v26 = vld [vmem:[#allocation8 + $0x90] sm:$0xff]  }
  0x52   :  { %502 = vmatpush1.bf16.msra.mxu0 %v1136_v30  ;;  %543 = vmatpush1.bf16.msra.mxu1 %v1137_v31  ;;  %v1212_v27 = vld [vmem:[#allocation8 + $0x48] sm:$0xff]   ;;  %v1216_v31 = vld [vmem:[#allocation8 + $0x40] sm:$0xff]  }
  0x53   :  { %503 = vmatprep.subr.bf16.mxu0 %v1138_v32  ;;  %544 = vmatprep.subr.bf16.mxu1 %v1140_v33  ;;  %v1213_v28 = vld [vmem:[#allocation8 + $0xc8] sm:$0xff]   ;;  %v1217_v32 = vld [vmem:[#allocation8 + $0xc0] sm:$0xff]  }
  0x54   :  { %v1214_v29 = vld [vmem:[#allocation8 + $0x8] sm:$0xff]   ;;  %v1218_v33 = vld [vmem:[#allocation8] sm:$0xff]  }
  0x55   :  { %v1215_v30 = vld [vmem:[#allocation8 + $0x88] sm:$0xff]  }
  0x56   :  { %504 = vmatpush2.bf16.msra.mxu0 %v1142_v34  ;;  %545 = vmatpush2.bf16.msra.mxu1 %v1143_v35  ;;  %v1219_v34 = vld [vmem:[#allocation8 + $0x80] sm:$0xff]   ;;  %v140_v35 = vlaneseq }
  0x57   :  { %505 = vmatprep.subr.bf16.mxu0 %v1144_v36  ;;  %546 = vmatprep.subr.bf16.mxu1 %v1146_v37 }
  0x58   :  { %v141_v36 = vshrl.u32 %v140_v35, 7 }
  0x5a   :  { %506 = vmatpush2.bf16.msra.mxu0 %v1148_v38  ;;  %547 = vmatpush2.bf16.msra.mxu1 %v1149_v39  ;;  %v142_v37 = vsub.s32 0, %v141_v36  ;;  %v150_v38 = vsub.s32 2, %v141_v36  ;;  %v138_v39 = vld [vmem:[#allocation7] sm:$0xf] }
  0x5b   :  { %507 = vmatprep.subr.bf16.mxu0 %v1150_v40  ;;  %548 = vmatprep.subr.bf16.mxu1 %v1152_v41  ;;  %v146_v40 = vsub.s32 1, %v141_v36  ;;  %v154_v41 = vsub.s32 3, %v141_v36 }
  0x5e   :  { %508 = vmatpush2.bf16.msra.mxu0 %v1154_v42  ;;  %549 = vmatpush2.bf16.msra.mxu1 %v1155_v43  ;;  %v143_v42 = vrot.slane %v138_v39, %v142_v37  ;;  %v151_v43 = vrot.slane %v138_v39, %v150_v38 }
  0x5f   :  { %509 = vmatprep.subr.bf16.mxu0 %v1156_v44  ;;  %550 = vmatprep.subr.bf16.mxu1 %v1158_v45  ;;  %v147_v44 = vrot.slane %v138_v39, %v146_v40  ;;  %v155_v45 = vrot.slane %v138_v39, %v154_v41 }
  0x62   :  { %510 = vmatpush2.bf16.msra.mxu0 %v1160_v46  ;;  %551 = vmatpush2.bf16.msra.mxu1 %v1161_v48 }
  0x63   :  { %511 = vmatprep.subr.bf16.mxu0 %v1162_v50  ;;  %552 = vmatprep.subr.bf16.mxu1 %v1164_v51 }
  0x66   :  { %512 = vmatpush2.bf16.msra.mxu0 %v1166_v52  ;;  %553 = vmatpush2.bf16.msra.mxu1 %v1167_v53 }
  0x67   :  { %513 = vmatprep.subr.bf16.mxu0 %v1168_v54  ;;  %554 = vmatprep.subr.bf16.mxu1 %v1170_v55 }
  0x6a   :  { %514 = vmatpush2.bf16.msra.mxu0 %v1172_v56  ;;  %555 = vmatpush2.bf16.msra.mxu1 %v1173_v57 }
  0x6b   :  { %515 = vmatprep.subr.bf16.mxu0 %v1174_v58  ;;  %556 = vmatprep.subr.bf16.mxu1 %v1176_v59 }
  0x6e   :  { %516 = vmatpush2.bf16.msra.mxu0 %v1178_v60  ;;  %557 = vmatpush2.bf16.msra.mxu1 %v1179_v61 }
  0x6f   :  { %517 = vmatprep.subr.bf16.mxu0 %v1180_v62  ;;  %558 = vmatprep.subr.bf16.mxu1 %v1182_v63 }
  0x72   :  { %518 = vmatpush2.bf16.msra.mxu0 %v1184_v0  ;;  %559 = vmatpush2.bf16.msra.mxu1 %v1185_v1 }
  0x73   :  { %1037 = vmatprep.subr.bf16.mxu0 %v1188_v2  ;;  %1059 = vmatprep.subr.bf16.mxu1 %v1189_v3 }
  0x75   :  { %520 = vmatmul.mubr.bf16.vlgmr.msra.gmra.mxu0 %v938_v5  ;;  %561 = vmatmul.mubr.bf16.vlgmr.msra.gmra.mxu1 %v938_v5 }
  0x76   :  { %1038 = vmatpush3.bf16.msra.mxu0 %v1190_v4  ;;  %1060 = vmatpush3.bf16.msra.mxu1 %v1191_v6  ;;  %v1004_v4 = vld [vmem:[%s1389_s4] ss:$0 sm:$0xff] }
  0x77   :  { %1039 = vmatprep.subr.bf16.mxu0 %v1192_v7  ;;  %1061 = vmatprep.subr.bf16.mxu1 %v1193_v8 }
  0x7a   :  { %1040 = vmatpush3.bf16.msra.mxu0 %v1194_v9  ;;  %1062 = vmatpush3.bf16.msra.mxu1 %v1195_v10 }
  0x7b   :  { %1041 = vmatprep.subr.bf16.mxu0 %v1196_v11  ;;  %1063 = vmatprep.subr.bf16.mxu1 %v1197_v12 }
  0x7e   :  { %1042 = vmatpush3.bf16.msra.mxu0 %v1198_v13  ;;  %1064 = vmatpush3.bf16.msra.mxu1 %v1199_v14 }
  0x7f   :  { %1043 = vmatprep.subr.bf16.mxu0 %v1200_v15  ;;  %1065 = vmatprep.subr.bf16.mxu1 %v1201_v16 }
  0x82   :  { %1044 = vmatpush3.bf16.msra.mxu0 %v1202_v17  ;;  %1066 = vmatpush3.bf16.msra.mxu1 %v1203_v18 }
  0x83   :  { %1045 = vmatprep.subr.bf16.mxu0 %v1204_v19  ;;  %1067 = vmatprep.subr.bf16.mxu1 %v1205_v20 }
  0x86   :  { %1046 = vmatpush3.bf16.msra.mxu0 %v1206_v21  ;;  %1068 = vmatpush3.bf16.msra.mxu1 %v1207_v22 }
  0x87   :  { %1047 = vmatprep.subr.bf16.mxu0 %v1208_v23  ;;  %1069 = vmatprep.subr.bf16.mxu1 %v1209_v24 }
  0x8a   :  { %1048 = vmatpush3.bf16.msra.mxu0 %v1210_v25  ;;  %1070 = vmatpush3.bf16.msra.mxu1 %v1211_v26 }
  0x8b   :  { %1049 = vmatprep.subr.bf16.mxu0 %v1212_v27  ;;  %1071 = vmatprep.subr.bf16.mxu1 %v1213_v28 }
  0x8e   :  { %1050 = vmatpush3.bf16.msra.mxu0 %v1214_v29  ;;  %1072 = vmatpush3.bf16.msra.mxu1 %v1215_v30 }
  0x8f   :  { %1051 = vmatprep.subr.bf16.mxu0 %v1216_v31  ;;  %1073 = vmatprep.subr.bf16.mxu1 %v1217_v32 }
  0x92   :  { %1052 = vmatpush3.bf16.msra.mxu0 %v1218_v33  ;;  %1074 = vmatpush3.bf16.msra.mxu1 %v1219_v34 }
 0x135   :  { %v521_v46 = vpop.f32.mrf.mxu0  ;;  %v562_v47 = vpop.f32.mrf.mxu1 }
 0x136   :  { %v522_v48 = vadd.f32 %v521_v46, %v143_v42  ;;  %v563_v49 = vadd.f32 %v562_v47, %v151_v43 }
 0x137   :  { %v523_v50 = vpop.f32.mrf.mxu0  ;;  %v564_v51 = vpop.f32.mrf.mxu1 }
 0x138   :  { %v571_v52 = vmax.f32 %v563_v49, 0.0  ;;  %v524_v53 = vadd.f32 %v523_v50, %v147_v44  ;;  %v565_v54 = vadd.f32 %v564_v51, %v155_v45  ;;  %v569_v55 = vmax.f32 %v522_v48, 0.0 }
 0x139   :  { %v525_v56 = vpop.f32.mrf.mxu0  ;;  %v566_v57 = vpop.f32.mrf.mxu1 }
 0x13a   :  { %v570_v58 = vmax.f32 %v524_v53, 0.0  ;;  %v572_v59 = vmax.f32 %v565_v54, 0.0  ;;  %v575_v60 = vpack.c.bf16 %v571_v52, %v571_v52  ;;  %v573_v1 = vpack.c.bf16 %v569_v55, %v569_v55 }
 0x13b   :  { %v526_v61 = vpop.f32.mrf.mxu0  ;;  %v567_v62 = vpop.f32.mrf.mxu1 }
 0x13c   :  { %v574_v63 = vpack.c.bf16 %v570_v58, %v570_v58  ;;  %v576_v0 = vpack.c.bf16 %v572_v59, %v572_v59 }
 0x13e   :  { %872 = vmatprep.mubr.bf16.mxu0 %v574_v63  ;;  %912 = vmatprep.mubr.bf16.mxu1 %v576_v0 }
 0x13f   :  { %873 = vmatmul.mubr.bf16.vlgmr.msra.gmra.mxu0 %v573_v1  ;;  %913 = vmatmul.mubr.bf16.vlgmr.msra.gmra.mxu1 %v575_v60 }
 0x1ff   :  { %v1053_v2 = vpop.f32.mrf.mxu0  ;;  %v1075_v3 = vpop.f32.mrf.mxu1 }
 0x201   :  { %v1054_v5 = vpop.f32.mrf.mxu0  ;;  %v1076_v6 = vpop.f32.mrf.mxu1 }
 0x202   :  { %v1055_v7 = vadd.f32 %v1054_v5, %v1053_v2  ;;  %v1077_v11 = vadd.f32 %v1076_v6, %v1075_v3 }
 0x203   :  { %v1056_v8 = vpop.f32.mrf.mxu0  ;;  %v1078_v9 = vpop.f32.mrf.mxu1 }
 0x204   :  { %v875_v10 = vadd.f32 %v1055_v7, %v1004_v4 }
 0x205   :  { %v1057_v12 = vpop.f32.mrf.mxu0  ;;  %v1079_v13 = vpop.f32.mrf.mxu1 }
 0x206   :  { %v915_v14 = vadd.f32 %v1077_v11, %v875_v10 }
 0x208   :  { %920 = vst [vmem:[#allocation10] sm:$0xff] %v915_v14 }
 0x209   :  { %1311 = shalt.err (!%p1308_p10)
}
 0x20a   :  { %930 = dma.vmem_to_hbm [thread:$0]  %s928_s16, 128, %s1390_s5, [#allocation4]  }
 0x20b   :  { %1326 = dma.done.wait [#allocation4], 128  }
 0x20c   :  { %1327 = vsyncadd [#allocation4], 4294967168 }
 0x20d   :  { %934 = vsyncpa [#allocation3], 1 }
 0x20e   :  { %935 = vsyncpa [#allocation6], 1 }
 0x20f   :  { %936 = vsyncpa [#allocation9], 1 }
 0x210   :  { %937 = vsyncpa [#allocation4], 1 }

</bundles_post_ra>
